<compile_context>
chip_gen: v6e
topology: v6e:2x2x1
jax: 0.10.0
libtpu: 0.0.40
codegen_flags: <defaults>
</compile_context>

<pallas_src>
import math
import jax
import jax.numpy as jnp
from jax.experimental import pallas as pl
from jax.experimental.pallas import tpu as pltpu

B, T, E, H = 2, 8, 32, 4          # batch, seq (== block_size), embed_dim, num_heads
DH = E // H                        # head dim
QK = 2 * E                         # lane offset of the folded V·Wo block in fused output
F = 2 * E + H * E                  # fused projection width: q | k | per-head (V @ Wo) = 192
HIGHEST = jax.lax.Precision.HIGHEST


def mhsa_kernel(xf_ref, w_ref, b_ref, bo_ref, out_ref, attw_ref):
    # One fused MXU matmul: [q * 1/sqrt(DH) | k | per-head V@Wo], lane width 192.
    qkv = jnp.dot(xf_ref[...], w_ref[...],
                  preferred_element_type=jnp.float32) + b_ref[...]    # (B*T, F)
    qkv = qkv.reshape(B, T, F)                                        # clean (8,*) row split

    # Float tril(ones) mask ADDED to the scores (PyTorch float attn_mask semantics).
    row = jax.lax.broadcasted_iota(jnp.int32, (T, T), 0)
    col = jax.lax.broadcasted_iota(jnp.int32, (T, T), 1)
    add_mask = (row >= col).astype(jnp.float32)[None]                 # (1, T, T)

    acc = jnp.zeros((B, T, E), jnp.float32)        # attention output (out_proj folded in)
    psum = jnp.zeros((B, T, T), jnp.float32)       # sum of per-head softmax weights
    for h in range(H):                             # static loop; no concat / no out_proj matmul
        qh = qkv[:, :, h * DH:(h + 1) * DH]                           # (B, T, DH), pre-scaled
        kh = qkv[:, :, E + h * DH:E + (h + 1) * DH]                   # (B, T, DH)
        voh = qkv[:, :, QK + h * E:QK + (h + 1) * E]                  # (B, T, E) = V_h @ Wo_h
        s = jnp.einsum('bqd,bkd->bqk', qh, kh,
                       preferred_element_type=jnp.float32) + add_mask
        s = s - jnp.max(s, axis=-1, keepdims=True)
        p = jnp.exp(s)
        p = p * pl.reciprocal(jnp.sum(p, axis=-1, keepdims=True), approx=False)
        psum = psum + p
        acc = acc + jnp.einsum('bqk,bke->bqe', p, voh,
                               preferred_element_type=jnp.float32)
    out_ref[...] = acc + bo_ref[...]               # out_proj bias added once
    attw_ref[...] = psum * (1.0 / H)               # average_attn_weights=True


def fuse_params(params):
    """Host-side algebraic fusion of self.q/k/v, MHA in_proj, score scale and out_proj."""
    (Wq, bq, Wk, bk, Wv, bv, Wqm, bqm, Wkm, bkm, Wvm, bvm, Wo, bo) = params
    dot = lambda a, b: jnp.dot(a, b, precision=HIGHEST)
    scale = 1.0 / math.sqrt(DH)
    Wq_f = dot(Wq, Wqm) * scale
    bq_f = (dot(bq, Wqm) + bqm) * scale
    Wk_f = dot(Wk, Wkm)
    bk_f = dot(bk, Wkm) + bkm
    Wv_f = dot(Wv, Wvm)
    bv_f = dot(bv, Wvm) + bvm
    # Fold out_proj weight into V per head: (E, H*E) / (H*E,)
    Wvo = jnp.concatenate(
        [dot(Wv_f[:, h * DH:(h + 1) * DH], Wo[h * DH:(h + 1) * DH, :]) for h in range(H)],
        axis=1)
    bvo = jnp.concatenate(
        [dot(bv_f[h * DH:(h + 1) * DH], Wo[h * DH:(h + 1) * DH, :]) for h in range(H)],
        axis=0)
    wbig = jnp.concatenate([Wq_f, Wk_f, Wvo], axis=1)                 # (E, F) = (32, 192)
    bbig = jnp.concatenate([bq_f, bk_f, bvo], axis=0)[None, :]        # (1, F)
    return wbig, bbig, bo[None, :]


def multi_head_self_attention(x, params):
    wbig, bbig, bo2 = fuse_params(params)
    xf = x.reshape(B * T, E)                       # flatten batch rows for the projection
    vmem = pltpu.MemorySpace.VMEM
    out, attw = pl.pallas_call(
        mhsa_kernel,
        out_shape=(jax.ShapeDtypeStruct((B, T, E), jnp.float32),
                   jax.ShapeDtypeStruct((B, T, T), jnp.float32)),
        in_specs=[pl.BlockSpec(memory_space=vmem)] * 4,
        out_specs=(pl.BlockSpec(memory_space=vmem),
                   pl.BlockSpec(memory_space=vmem)),
    )(xf, wbig, bbig, bo2)
    return out, attw


def reference(x, params):
    """Pure-JAX mirror of the PyTorch forward (unfused, full f32 precision)."""
    (Wq, bq, Wk, bk, Wv, bv, Wqm, bqm, Wkm, bkm, Wvm, bvm, Wo, bo) = params
    dot = lambda a, b: jnp.dot(a, b, precision=HIGHEST)
    q = dot(dot(x, Wq) + bq, Wqm) + bqm
    k = dot(dot(x, Wk) + bk, Wkm) + bkm
    v = dot(dot(x, Wv) + bv, Wvm) + bvm
    qh = q.reshape(B, T, H, DH).transpose(0, 2, 1, 3)
    kh = k.reshape(B, T, H, DH).transpose(0, 2, 1, 3)
    vh = v.reshape(B, T, H, DH).transpose(0, 2, 1, 3)
    mask = jnp.tril(jnp.ones((T, T), jnp.float32))
    s = jnp.einsum('bhqd,bhkd->bhqk', qh, kh, precision=HIGHEST) / math.sqrt(DH) + mask
    p = jax.nn.softmax(s, axis=-1)
    o = jnp.einsum('bhqk,bhkd->bhqd', p, vh,
                   precision=HIGHEST).transpose(0, 2, 1, 3).reshape(B, T, E)
    return dot(o, Wo) + bo, p.mean(axis=1)


def make_params(key):
    ks = jax.random.split(key, 14)
    std = 0.05
    n = lambda k, s: std * jax.random.normal(k, s, jnp.float32)
    Wq, bq = n(ks[0], (E, E)), n(ks[1], (E,))
    Wk, bk = n(ks[2], (E, E)), n(ks[3], (E,))
    Wv, bv = n(ks[4], (E, E)), n(ks[5], (E,))
    Wqm, bqm = n(ks[6], (E, E)), n(ks[7], (E,))
    Wkm, bkm = n(ks[8], (E, E)), n(ks[9], (E,))
    Wvm, bvm = n(ks[10], (E, E)), n(ks[11], (E,))
    Wo, bo = n(ks[12], (E, E)), n(ks[13], (E,))
    return (Wq, bq, Wk, bk, Wv, bv, Wqm, bqm, Wkm, bkm, Wvm, bvm, Wo, bo)


if __name__ == "__main__":
    key = jax.random.PRNGKey(0)
    kx, kp = jax.random.split(key)
    x = jax.random.normal(kx, (B, T, E), jnp.float32)
    params = make_params(kp)

    mhsa = jax.jit(multi_head_self_attention)
    out, attw = mhsa(x, params)
    out = jax.block_until_ready(out)
    attw = jax.block_until_ready(attw)

    ref_out, ref_w = reference(x, params)
    assert out.shape == (B, T, E) and attw.shape == (B, T, T)
    # Tolerance covers potential MXU bf16-pass differences across TPU generations.
    assert jnp.allclose(out, ref_out, atol=2e-3, rtol=2e-3), float(jnp.abs(out - ref_out).max())
    assert jnp.allclose(attw, ref_w, atol=2e-3, rtol=2e-3), float(jnp.abs(attw - ref_w).max())
    print("KERNEL_OK")
</pallas_src>

<mosaic_0001>
module attributes {stable_mosaic.version = 11 : i64} {
  func.func @mhsa_kernel(%arg0: memref<16x32xf32, #tpu.memory_space<vmem>>, %arg1: memref<32x192xf32, #tpu.memory_space<vmem>>, %arg2: memref<1x192xf32, #tpu.memory_space<vmem>>, %arg3: memref<1x32xf32, #tpu.memory_space<vmem>>, %arg4: memref<2x8x32xf32, #tpu.memory_space<vmem>>, %arg5: memref<2x8x8xf32, #tpu.memory_space<vmem>>) attributes {dimension_semantics = [], scalar_prefetch = 0 : i64, scratch_operands = 0 : i64, tpu.core_type = #tpu.core_type<tc>} {
    %c0 = arith.constant 0 : index
    %c0_0 = arith.constant 0 : index
    %0 = vector.load %arg0[%c0, %c0_0] : memref<16x32xf32, #tpu.memory_space<vmem>>, vector<16x32xf32>
    %c0_1 = arith.constant 0 : index
    %c0_2 = arith.constant 0 : index
    %1 = vector.load %arg1[%c0_1, %c0_2] : memref<32x192xf32, #tpu.memory_space<vmem>>, vector<32x192xf32>
    %cst = arith.constant dense<0.000000e+00> : vector<16x192xf32>
    %2 = tpu.matmul %0, %1, %cst {dimension_numbers = #tpu.dot_dimension_numbers<[1], [0], [0], [1], [0, 0, 1, 1], [], []>} : vector<16x32xf32>, vector<32x192xf32>, vector<16x192xf32> -> vector<16x192xf32>
    %c0_3 = arith.constant 0 : index
    %c0_4 = arith.constant 0 : index
    %3 = vector.load %arg2[%c0_3, %c0_4] : memref<1x192xf32, #tpu.memory_space<vmem>>, vector<1x192xf32>
    %4 = vector.broadcast %3 : vector<1x192xf32> to vector<16x192xf32>
    %5 = arith.addf %2, %4 : vector<16x192xf32>
    %6 = vector.shape_cast %5 : vector<16x192xf32> to vector<2x8x192xf32>
    %7 = tpu.iota {dimensions = array<i32: 0>} : vector<8x8xi32>
    %8 = tpu.iota {dimensions = array<i32: 1>} : vector<8x8xi32>
    %9 = arith.cmpi sge, %7, %8 : vector<8x8xi32>
    %10 = arith.extui %9 : vector<8x8xi1> to vector<8x8xi32>
    %11 = arith.sitofp %10 : vector<8x8xi32> to vector<8x8xf32>
    %12 = vector.shape_cast %11 : vector<8x8xf32> to vector<1x8x8xf32>
    %cst_5 = arith.constant 0.000000e+00 : f32
    %13 = vector.broadcast %cst_5 : f32 to vector<2x8x32xf32>
    %cst_6 = arith.constant 0.000000e+00 : f32
    %14 = vector.broadcast %cst_6 : f32 to vector<2x8x8xf32>
    %15 = vector.extract_strided_slice %6 {offsets = [0, 0, 0], sizes = [2, 8, 8], strides = [1, 1, 1]} : vector<2x8x192xf32> to vector<2x8x8xf32>
    %16 = vector.extract_strided_slice %6 {offsets = [0, 0, 32], sizes = [2, 8, 8], strides = [1, 1, 1]} : vector<2x8x192xf32> to vector<2x8x8xf32>
    %17 = vector.extract_strided_slice %6 {offsets = [0, 0, 64], sizes = [2, 8, 32], strides = [1, 1, 1]} : vector<2x8x192xf32> to vector<2x8x32xf32>
    "tpu.trace_start"() <{level = 10 : i32, message = "bqd,bkd->bqk"}> : () -> ()
    %cst_7 = arith.constant dense<0.000000e+00> : vector<2x8x8xf32>
    %18 = tpu.matmul %15, %16, %cst_7 {dimension_numbers = #tpu.dot_dimension_numbers<[2], [2], [1], [1], [0, 0, 0, 1, 1, 1], [0], [0]>} : vector<2x8x8xf32>, vector<2x8x8xf32>, vector<2x8x8xf32> -> vector<2x8x8xf32>
    "tpu.trace_stop"() : () -> ()
    %19 = vector.broadcast %12 : vector<1x8x8xf32> to vector<2x8x8xf32>
    %20 = arith.addf %18, %19 : vector<2x8x8xf32>
    %cst_8 = arith.constant dense<0xFF800000> : vector<2x8xf32>
    %21 = vector.multi_reduction <maximumf>, %20, %cst_8 [2] : vector<2x8x8xf32> to vector<2x8xf32>
    %22 = vector.shape_cast %21 : vector<2x8xf32> to vector<2x8x1xf32>
    %23 = vector.broadcast %22 : vector<2x8x1xf32> to vector<2x8x8xf32>
    %24 = arith.subf %20, %23 : vector<2x8x8xf32>
    %25 = math.exp %24 : vector<2x8x8xf32>
    %cst_9 = arith.constant dense<0.000000e+00> : vector<2x8xf32>
    %26 = vector.multi_reduction <add>, %25, %cst_9 [2] : vector<2x8x8xf32> to vector<2x8xf32>
    %27 = vector.shape_cast %26 : vector<2x8xf32> to vector<2x8x1xf32>
    %28 = tpu.reciprocal %27 : vector<2x8x1xf32> -> vector<2x8x1xf32>
    %29 = vector.broadcast %28 : vector<2x8x1xf32> to vector<2x8x8xf32>
    %30 = arith.mulf %25, %29 : vector<2x8x8xf32>
    %31 = arith.addf %14, %30 : vector<2x8x8xf32>
    "tpu.trace_start"() <{level = 10 : i32, message = "bqk,bke->bqe"}> : () -> ()
    %cst_10 = arith.constant dense<0.000000e+00> : vector<2x8x32xf32>
    %32 = tpu.matmul %30, %17, %cst_10 {dimension_numbers = #tpu.dot_dimension_numbers<[2], [1], [1], [2], [0, 0, 0, 1, 1, 2], [0], [0]>} : vector<2x8x8xf32>, vector<2x8x32xf32>, vector<2x8x32xf32> -> vector<2x8x32xf32>
    "tpu.trace_stop"() : () -> ()
    %33 = arith.addf %13, %32 : vector<2x8x32xf32>
    %34 = vector.extract_strided_slice %6 {offsets = [0, 0, 8], sizes = [2, 8, 8], strides = [1, 1, 1]} : vector<2x8x192xf32> to vector<2x8x8xf32>
    %35 = vector.extract_strided_slice %6 {offsets = [0, 0, 40], sizes = [2, 8, 8], strides = [1, 1, 1]} : vector<2x8x192xf32> to vector<2x8x8xf32>
    %36 = vector.extract_strided_slice %6 {offsets = [0, 0, 96], sizes = [2, 8, 32], strides = [1, 1, 1]} : vector<2x8x192xf32> to vector<2x8x32xf32>
    "tpu.trace_start"() <{level = 10 : i32, message = "bqd,bkd->bqk"}> : () -> ()
    %cst_11 = arith.constant dense<0.000000e+00> : vector<2x8x8xf32>
    %37 = tpu.matmul %34, %35, %cst_11 {dimension_numbers = #tpu.dot_dimension_numbers<[2], [2], [1], [1], [0, 0, 0, 1, 1, 1], [0], [0]>} : vector<2x8x8xf32>, vector<2x8x8xf32>, vector<2x8x8xf32> -> vector<2x8x8xf32>
    "tpu.trace_stop"() : () -> ()
    %38 = vector.broadcast %12 : vector<1x8x8xf32> to vector<2x8x8xf32>
    %39 = arith.addf %37, %38 : vector<2x8x8xf32>
    %cst_12 = arith.constant dense<0xFF800000> : vector<2x8xf32>
    %40 = vector.multi_reduction <maximumf>, %39, %cst_12 [2] : vector<2x8x8xf32> to vector<2x8xf32>
    %41 = vector.shape_cast %40 : vector<2x8xf32> to vector<2x8x1xf32>
    %42 = vector.broadcast %41 : vector<2x8x1xf32> to vector<2x8x8xf32>
    %43 = arith.subf %39, %42 : vector<2x8x8xf32>
    %44 = math.exp %43 : vector<2x8x8xf32>
    %cst_13 = arith.constant dense<0.000000e+00> : vector<2x8xf32>
    %45 = vector.multi_reduction <add>, %44, %cst_13 [2] : vector<2x8x8xf32> to vector<2x8xf32>
    %46 = vector.shape_cast %45 : vector<2x8xf32> to vector<2x8x1xf32>
    %47 = tpu.reciprocal %46 : vector<2x8x1xf32> -> vector<2x8x1xf32>
    %48 = vector.broadcast %47 : vector<2x8x1xf32> to vector<2x8x8xf32>
    %49 = arith.mulf %44, %48 : vector<2x8x8xf32>
    %50 = arith.addf %31, %49 : vector<2x8x8xf32>
    "tpu.trace_start"() <{level = 10 : i32, message = "bqk,bke->bqe"}> : () -> ()
    %cst_14 = arith.constant dense<0.000000e+00> : vector<2x8x32xf32>
    %51 = tpu.matmul %49, %36, %cst_14 {dimension_numbers = #tpu.dot_dimension_numbers<[2], [1], [1], [2], [0, 0, 0, 1, 1, 2], [0], [0]>} : vector<2x8x8xf32>, vector<2x8x32xf32>, vector<2x8x32xf32> -> vector<2x8x32xf32>
    "tpu.trace_stop"() : () -> ()
    %52 = arith.addf %33, %51 : vector<2x8x32xf32>
    %53 = vector.extract_strided_slice %6 {offsets = [0, 0, 16], sizes = [2, 8, 8], strides = [1, 1, 1]} : vector<2x8x192xf32> to vector<2x8x8xf32>
    %54 = vector.extract_strided_slice %6 {offsets = [0, 0, 48], sizes = [2, 8, 8], strides = [1, 1, 1]} : vector<2x8x192xf32> to vector<2x8x8xf32>
    %55 = vector.extract_strided_slice %6 {offsets = [0, 0, 128], sizes = [2, 8, 32], strides = [1, 1, 1]} : vector<2x8x192xf32> to vector<2x8x32xf32>
    "tpu.trace_start"() <{level = 10 : i32, message = "bqd,bkd->bqk"}> : () -> ()
    %cst_15 = arith.constant dense<0.000000e+00> : vector<2x8x8xf32>
    %56 = tpu.matmul %53, %54, %cst_15 {dimension_numbers = #tpu.dot_dimension_numbers<[2], [2], [1], [1], [0, 0, 0, 1, 1, 1], [0], [0]>} : vector<2x8x8xf32>, vector<2x8x8xf32>, vector<2x8x8xf32> -> vector<2x8x8xf32>
    "tpu.trace_stop"() : () -> ()
    %57 = vector.broadcast %12 : vector<1x8x8xf32> to vector<2x8x8xf32>
    %58 = arith.addf %56, %57 : vector<2x8x8xf32>
    %cst_16 = arith.constant dense<0xFF800000> : vector<2x8xf32>
    %59 = vector.multi_reduction <maximumf>, %58, %cst_16 [2] : vector<2x8x8xf32> to vector<2x8xf32>
    %60 = vector.shape_cast %59 : vector<2x8xf32> to vector<2x8x1xf32>
    %61 = vector.broadcast %60 : vector<2x8x1xf32> to vector<2x8x8xf32>
    %62 = arith.subf %58, %61 : vector<2x8x8xf32>
    %63 = math.exp %62 : vector<2x8x8xf32>
    %cst_17 = arith.constant dense<0.000000e+00> : vector<2x8xf32>
    %64 = vector.multi_reduction <add>, %63, %cst_17 [2] : vector<2x8x8xf32> to vector<2x8xf32>
    %65 = vector.shape_cast %64 : vector<2x8xf32> to vector<2x8x1xf32>
    %66 = tpu.reciprocal %65 : vector<2x8x1xf32> -> vector<2x8x1xf32>
    %67 = vector.broadcast %66 : vector<2x8x1xf32> to vector<2x8x8xf32>
    %68 = arith.mulf %63, %67 : vector<2x8x8xf32>
    %69 = arith.addf %50, %68 : vector<2x8x8xf32>
    "tpu.trace_start"() <{level = 10 : i32, message = "bqk,bke->bqe"}> : () -> ()
    %cst_18 = arith.constant dense<0.000000e+00> : vector<2x8x32xf32>
    %70 = tpu.matmul %68, %55, %cst_18 {dimension_numbers = #tpu.dot_dimension_numbers<[2], [1], [1], [2], [0, 0, 0, 1, 1, 2], [0], [0]>} : vector<2x8x8xf32>, vector<2x8x32xf32>, vector<2x8x32xf32> -> vector<2x8x32xf32>
    "tpu.trace_stop"() : () -> ()
    %71 = arith.addf %52, %70 : vector<2x8x32xf32>
    %72 = vector.extract_strided_slice %6 {offsets = [0, 0, 24], sizes = [2, 8, 8], strides = [1, 1, 1]} : vector<2x8x192xf32> to vector<2x8x8xf32>
    %73 = vector.extract_strided_slice %6 {offsets = [0, 0, 56], sizes = [2, 8, 8], strides = [1, 1, 1]} : vector<2x8x192xf32> to vector<2x8x8xf32>
    %74 = vector.extract_strided_slice %6 {offsets = [0, 0, 160], sizes = [2, 8, 32], strides = [1, 1, 1]} : vector<2x8x192xf32> to vector<2x8x32xf32>
    "tpu.trace_start"() <{level = 10 : i32, message = "bqd,bkd->bqk"}> : () -> ()
    %cst_19 = arith.constant dense<0.000000e+00> : vector<2x8x8xf32>
    %75 = tpu.matmul %72, %73, %cst_19 {dimension_numbers = #tpu.dot_dimension_numbers<[2], [2], [1], [1], [0, 0, 0, 1, 1, 1], [0], [0]>} : vector<2x8x8xf32>, vector<2x8x8xf32>, vector<2x8x8xf32> -> vector<2x8x8xf32>
    "tpu.trace_stop"() : () -> ()
    %76 = vector.broadcast %12 : vector<1x8x8xf32> to vector<2x8x8xf32>
    %77 = arith.addf %75, %76 : vector<2x8x8xf32>
    %cst_20 = arith.constant dense<0xFF800000> : vector<2x8xf32>
    %78 = vector.multi_reduction <maximumf>, %77, %cst_20 [2] : vector<2x8x8xf32> to vector<2x8xf32>
    %79 = vector.shape_cast %78 : vector<2x8xf32> to vector<2x8x1xf32>
    %80 = vector.broadcast %79 : vector<2x8x1xf32> to vector<2x8x8xf32>
    %81 = arith.subf %77, %80 : vector<2x8x8xf32>
    %82 = math.exp %81 : vector<2x8x8xf32>
    %cst_21 = arith.constant dense<0.000000e+00> : vector<2x8xf32>
    %83 = vector.multi_reduction <add>, %82, %cst_21 [2] : vector<2x8x8xf32> to vector<2x8xf32>
    %84 = vector.shape_cast %83 : vector<2x8xf32> to vector<2x8x1xf32>
    %85 = tpu.reciprocal %84 : vector<2x8x1xf32> -> vector<2x8x1xf32>
    %86 = vector.broadcast %85 : vector<2x8x1xf32> to vector<2x8x8xf32>
    %87 = arith.mulf %82, %86 : vector<2x8x8xf32>
    %88 = arith.addf %69, %87 : vector<2x8x8xf32>
    "tpu.trace_start"() <{level = 10 : i32, message = "bqk,bke->bqe"}> : () -> ()
    %cst_22 = arith.constant dense<0.000000e+00> : vector<2x8x32xf32>
    %89 = tpu.matmul %87, %74, %cst_22 {dimension_numbers = #tpu.dot_dimension_numbers<[2], [1], [1], [2], [0, 0, 0, 1, 1, 2], [0], [0]>} : vector<2x8x8xf32>, vector<2x8x32xf32>, vector<2x8x32xf32> -> vector<2x8x32xf32>
    "tpu.trace_stop"() : () -> ()
    %90 = arith.addf %71, %89 : vector<2x8x32xf32>
    %c0_23 = arith.constant 0 : index
    %c0_24 = arith.constant 0 : index
    %91 = vector.load %arg3[%c0_23, %c0_24] : memref<1x32xf32, #tpu.memory_space<vmem>>, vector<1x32xf32>
    %92 = vector.shape_cast %91 : vector<1x32xf32> to vector<1x1x32xf32>
    %93 = vector.broadcast %92 : vector<1x1x32xf32> to vector<2x8x32xf32>
    %94 = arith.addf %90, %93 : vector<2x8x32xf32>
    %c0_25 = arith.constant 0 : index
    %c0_26 = arith.constant 0 : index
    %c0_27 = arith.constant 0 : index
    %95 = vector.load %arg4[%c0_25, %c0_26, %c0_27] : memref<2x8x32xf32, #tpu.memory_space<vmem>>, vector<2x8x32xf32>
    tpu.vector_store %arg4[%c0_25, %c0_26, %c0_27], %94 {strides = array<i32>} : memref<2x8x32xf32, #tpu.memory_space<vmem>>, vector<2x8x32xf32>,
    %cst_28 = arith.constant 2.500000e-01 : f32
    %96 = vector.broadcast %cst_28 : f32 to vector<2x8x8xf32>
    %97 = arith.mulf %88, %96 : vector<2x8x8xf32>
    %c0_29 = arith.constant 0 : index
    %c0_30 = arith.constant 0 : index
    %c0_31 = arith.constant 0 : index
    %98 = vector.load %arg5[%c0_29, %c0_30, %c0_31] : memref<2x8x8xf32, #tpu.memory_space<vmem>>, vector<2x8x8xf32>
    tpu.vector_store %arg5[%c0_29, %c0_30, %c0_31], %97 {strides = array<i32>} : memref<2x8x8xf32, #tpu.memory_space<vmem>>, vector<2x8x8xf32>,
    return
  }
}

</mosaic_0001>

<bundles_post_ra>
// kernel: multi_head_self_attention.1
= control target key start
LH: loop header
LB: loop body
LE: loop exit
PB: predicated region body
PF: predicated region fallthrough
CT: control target
= control target key end

     0   :  { %11 = vsyncpa [#allocation3], 0  ;;  %v1739_v4 = vmov 0.0   ;;  %s1999_s0 = inlined_call_operand.vmem [shape: f32[16,32], index: 0, kind: input, shape index: {}]   ;;  %s2000_s1 = inlined_call_operand.vmem [shape: f32[32,192], index: 1, kind: input, shape index: {}]   ;;  %s2001_s2 = inlined_call_operand.vmem [shape: f32[1,192], index: 2, kind: input, shape index: {}]   ;;  %s2002_s3 = inlined_call_operand.vmem [shape: f32[1,32], index: 3, kind: input, shape index: {}]   ;;  %s2003_s4 = inlined_call_operand.hbm [shape: f32[2,8,32], index: 4, kind: output, shape index: {0}]   ;;  %s2004_s5 = inlined_call_operand.hbm [shape: f32[2,8,8], index: 5, kind: output, shape index: {1}]  }
   0x1   :  { %v30_v0 = vld [vmem:[%s2000_s1 + $0x38] sm:$0xff]  ;;  %v29_v1 = vld [vmem:[%s2000_s1 + $0x30] sm:$0xff]  ;;  %v28_v2 = vld [vmem:[%s2000_s1 + $0x28] sm:$0xff]  ;;  %114 = vmatprep.mubr.f32.mxu0 %v1739_v4  ;;  %1568 = vmatprep.subr.mxu1 %v1739_v4 }
   0x2   :  { %74 = vmatprep.subr.mxu0 %v30_v0  ;;  %v27_v3 = vld [vmem:[%s2000_s1 + $0x20] sm:$0xff]  ;;  %v26_v5 = vld [vmem:[%s2000_s1 + $0x18] sm:$0xff]  ;;  %v25_v6 = vld [vmem:[%s2000_s1 + $0x10] sm:$0xff] }
   0x3   :  { %75 = vmatpush1.msra.mxu0 %v29_v1 }
   0x4   :  { %76 = vmatprep.subr.mxu0 %v28_v2 }
   0x5   :  { %12 = vsyncpa [#allocation5], 0  ;;  %77 = vmatpush1.msra.mxu0 %v27_v3  ;;  %v24_v7 = vld [vmem:[%s2000_s1 + $0x8] sm:$0xff]  ;;  %v23_v8 = vld [vmem:[%s2000_s1] sm:$0xff]  ;;  %vm43_vm0 = vcmask 261120   ;;  %v33_v11 = vlaneseq  ;;  %vm1740_vm1 = vmmov 0  }
   0x6   :  { %78 = vmatprep.subr.mxu0 %v26_v5  ;;  %v21_v9 = vld [vmem:[%s1999_s0] sm:$0xff]  ;;  %v22_v10 = vld [vmem:[%s1999_s0 + $0x8] sm:$0xff]  ;;  %1570 = vmatprep.mubr.msk.f32.mxu1 %vm1740_vm1, %v1739_v4  ;;  %s1741_s0 = smov 88   ;;  %s1742_s14 = smov 96   ;;  %vm137_vm2 = vcmask 64512  }
   0x7   :  { %79 = vmatpush1.msra.mxu0 %v25_v6  ;;  %v1820_v12 = vshrl.u32 %v33_v11, 7  ;;  %v1830_v14 = vld [vmem:[%s2001_s2] sm:$0x3]  ;;  %s1743_s2 = smov 120   ;;  %v130_v27 = vand.u32 127, %v33_v11  ;;  %s1744_s15 = smov 32  }
   0x8   :  { %80 = vmatprep.subr.mxu0 %v24_v7  ;;  %s1745_s16 = smov 64   ;;  %s1746_s17 = smov 80  }
   0x9   :  { %81 = vmatpush1.msra.mxu0 %v23_v8  ;;  %v35_v13 = vsub.s32 0, %v1820_v12  ;;  %vm131_vm3 = vcmp.ge.s32.totalorder %v1820_v12, %v130_v27  ;;  %s1747_s18 = smov 112   ;;  %s1748_s19 = smov 72  }
   0xa   :  { %1508 = vmatmul.mubr.msk.f32.vlgmr.msra.gmra.mxu0 %vm43_vm0, %v21_v9  ;;  %1583 = vmatprep.subr.mxu0 %v1739_v4  ;;  %v1871_v28 = vsel %vm131_vm3, 1.0, %v1739_v4  ;;  %s1749_s20 = smov 104   ;;  %s1750_s21 = smov [#allocation4]  }
   0xb   :  { %120 = vmatprep.mubr.f32.mxu0 %v1739_v4  ;;  %v36_v15 = vrot.slane %v1830_v14, %v35_v13  ;;  %s1493_s22 = sshll.u32 %s1750_s21, 4  ;;  %s1494_s22 = int_to_ptr.vmem [resolvable:$true] %s1493_s22 }
   0xc   :  { %s1695_s23 = scalar_lea.vmem %s1494_s22, 256  ;;  %p1700_p1 = scmp.lt.s32.totalorder %s1494_s22, %s1494_s22 }
   0xd   :  { %p1696_p0 = scmp.ne.s32.totalorder %s1494_s22, %s1695_s23  ;;  %p1701_p2 = scmp.lt.s32.totalorder %s1695_s23, %s1695_s23 }
   0xe   :  { %1509 = vmatmul.mubr.msk.f32.gmra.mxu0 %vm43_vm0, %v22_v10 }
   0xf   :  { %1585 = vmatprep.mubr.msk.f32.mxu0 %vm1740_vm1, %v1739_v4  ;;  %p1702_p3 = por %p1701_p2, %p1700_p1 }
  0x11   :  { %p1703_p4 = pnand %p1702_p3, %p1696_p0 }
  0xca   :  { %v116_v16 = vpop.f32.mrf.mxu0 }
  0xcb   :  { %v1833_v17 = vadd.f32 %v116_v16, %v36_v15 }
  0xcc   :  { %v1835_v18 = vpop.f32.mrf.mxu0 }
  0xcd   :  { %315 = vrot.lane.b32.xlu1 %v1833_v17, %s1741_s0  ;;  %135 = vrot.lane.b32.xlu0 %v1833_v17, %s1742_s14 }
  0xce   :  { %v122_v19 = vpop.f32.mrf.mxu0 }
  0xcf   :  { %v1840_v20 = vadd.f32 %v122_v19, %v36_v15 }
  0xd0   :  { %v1874_v32 = vpop.f32.mrf.mxu0 }
  0xd1   :  { %393 = vrot.lane.b32.xlu1 %v1840_v20, %s1741_s0  ;;  %213 = vrot.lane.b32.xlu0 %v1840_v20, %s1742_s14 }
  0xd5   :  { %391 = vrot.lane.b32.xlu1 %v1840_v20, %s1743_s2  ;;  %313 = vrot.lane.b32.xlu0 %v1833_v17, %s1743_s2 }
 0x13f   :  { %v316_v21 = vpop.permute.xlu1 %315  ;;  %v136_v22 = vpop.permute.xlu0 %135 }
 0x140   :  { %1569 = vmatpush3.xpose.msk.msra.mxu1 %vm137_vm2, %v136_v22 }
 0x141   :  { %1573 = vmatprep.subr.mxu1 %v1739_v4 }
 0x143   :  { %v394_v23 = vpop.permute.xlu1 %393  ;;  %1571 = vmatmul.mubr.msk.f32.vlgmr.msra.gmra.mxu1 %vm137_vm2, %v1833_v17  ;;  %v214_v24 = vpop.permute.xlu0 %213 }
 0x144   :  { %1574 = vmatpush3.xpose.msk.msra.mxu1 %vm137_vm2, %v214_v24  ;;  %1584 = vmatpush3.xpose.msk.msra.mxu0 %vm137_vm2, %v394_v23 }
 0x145   :  { %1575 = vmatprep.mubr.msk.f32.mxu1 %vm1740_vm1, %v1739_v4  ;;  %1578 = vmatprep.subr.mxu1 %v1739_v4 }
 0x146   :  { %1593 = vmatprep.subr.mxu0 %v1739_v4 }
 0x147   :  { %v392_v25 = vpop.permute.xlu1 %391  ;;  %1576 = vmatmul.mubr.msk.f32.vlgmr.msra.gmra.mxu1 %vm137_vm2, %v1840_v20  ;;  %v314_v26 = vpop.permute.xlu0 %313 }
 0x148   :  { %1579 = vmatpush3.xpose.msk.msra.mxu1 %vm137_vm2, %v316_v21  ;;  %1586 = vmatmul.mubr.msk.f32.vlgmr.msra.gmra.mxu0 %vm137_vm2, %v392_v25  ;;  %v39_v21 = vsub.s32 1, %v1820_v12 }
 0x149   :  { %1580 = vmatprep.mubr.msk.f32.mxu1 %vm1740_vm1, %v1739_v4  ;;  %1588 = vmatprep.subr.mxu1 %v1739_v4 }
 0x14a   :  { %1595 = vmatprep.mubr.msk.f32.mxu0 %vm1740_vm1, %v1739_v4  ;;  %v40_v23 = vrot.slane %v1830_v14, %v39_v21 }
 0x14b   :  { %1581 = vmatmul.mubr.msk.f32.vlgmr.msra.gmra.mxu1 %vm137_vm2, %v314_v26 }
 0x14c   :  { %1590 = vmatprep.mubr.msk.f32.mxu1 %vm1740_vm1, %v1739_v4  ;;  %v1911_v24 = vadd.f32 %v1874_v32, %v40_v23 }
 0x203   :  { %v208_v29 = vpop.f32.mrf.mxu1 }
 0x204   :  { %v209_v30 = vadd.f32 %v1871_v28, %v208_v29 }
 0x205   :  { %v1572_v31 = vpop.f32.mrf.mxu1 }
 0x206   :  { %v289_v33 = vsel %vm137_vm2, %v209_v30, -inf  ;;  %v1930_v31 = vadd.f32 %v1835_v18, %v40_v23 }
 0x207   :  { %290 = vmax.xlane.f32.xlu0 %v289_v33  ;;  %v285_v34 = vpop.f32.mrf.mxu1 }
 0x208   :  { %v465_v35 = vpop.f32.mrf.mxu0  ;;  %v286_v43 = vadd.f32 %v1871_v28, %v285_v34 }
 0x209   :  { %v466_v36 = vadd.f32 %v1871_v28, %v465_v35  ;;  %v1577_v37 = vpop.f32.mrf.mxu1 }
 0x20a   :  { %v1587_v38 = vpop.f32.mrf.mxu0  ;;  %v292_v45 = vsel %vm137_vm2, %v286_v43, -inf }
 0x20b   :  { %v387_v39 = vpop.f32.mrf.mxu1  ;;  %v472_v40 = vsel %vm137_vm2, %v466_v36, -inf }
 0x20c   :  { %v388_v41 = vadd.f32 %v1871_v28, %v387_v39  ;;  %473 = vmax.xlane.f32.xlu1 %v472_v40 }
 0x20d   :  { %v1582_v42 = vpop.f32.mrf.mxu1 }
 0x20e   :  { %v469_v44 = vsel %vm137_vm2, %v388_v41, -inf }
 0x20f   :  { %470 = vmax.xlane.f32.xlu0 %v469_v44 }
 0x213   :  { %293 = vmax.xlane.f32.xlu0 %v292_v45 }
 0x21d   :  { %493 = vrot.lane.b32.xlu1 %v1833_v17, %s1744_s15 }
 0x221   :  { %645 = vrot.lane.b32.xlu1 %v1833_v17, %s1745_s16 }
 0x225   :  { %721 = vrot.lane.b32.xlu1 %v1840_v20, %s1745_s16 }
 0x229   :  { %569 = vrot.lane.b32.xlu0 %v1840_v20, %s1744_s15 }
 0x290   :  { %v291_v46 = vpop.xlane.xlu0 %290 }
 0x291   :  { %v295_v47 = vsub.f32 %v209_v30, %v291_v46 }
 0x293   :  { %v297_v48 = vmul.f32 1.442695, %v295_v47 }
 0x295   :  { %1663 = vpow2.f32 %v297_v48  ;;  %v474_v49 = vpop.xlane.xlu1 %473 }
 0x296   :  { %v476_v50 = vsub.f32 %v466_v36, %v474_v49 }
 0x298   :  { %v479_v51 = vmul.f32 1.442695, %v476_v50  ;;  %v471_v52 = vpop.xlane.xlu0 %470 }
 0x299   :  { %v494_v53 = vpop.permute.xlu1 %493  ;;  %v475_v0 = vsub.f32 %v388_v41, %v471_v52 }
 0x29a   :  { %1665 = vpow2.f32 %v479_v51  ;;  %1589 = vmatpush3.msra.mxu1 %v494_v53 }
 0x29b   :  { %1598 = vmatprep.subr.mxu1 %v1739_v4  ;;  %v477_v1 = vmul.f32 1.442695, %v475_v0 }
 0x29c   :  { %v294_v54 = vpop.xlane.xlu0 %293 }
 0x29d   :  { %v296_v55 = vsub.f32 %v286_v43, %v294_v54  ;;  %v646_v7 = vpop.permute.xlu1 %645 }
 0x29f   :  { %v299_v56 = vmul.f32 1.442695, %v296_v55 }
 0x2a0   :  { %v570_v57 = vpop.permute.xlu0 %569 }
 0x2a1   :  { %1667 = vpow2.f32 %v299_v56  ;;  %1594 = vmatpush3.msra.mxu0 %v570_v57  ;;  %v722_v9 = vpop.permute.xlu1 %721 }
 0x2a2   :  { %v1664_v58 = vpop.eup %1663  ;;  %1603 = vmatprep.subr.mxu0 %v1739_v4  ;;  %1669 = vpow2.f32 %v477_v1 }
 0x2a3   :  { %v301_v59 = vsel %vm137_vm2, %v1664_v58, 0.0 }
 0x2a4   :  { %302 = vadd.xlane.f32.xlu1 %v301_v59 }
 0x2a7   :  { %v1666_v60 = vpop.eup %1665 }
 0x2a8   :  { %v484_v61 = vsel %vm137_vm2, %v1666_v60, 0.0 }
 0x2a9   :  { %485 = vadd.xlane.f32.xlu0 %v484_v61 }
 0x2ae   :  { %v1668_v62 = vpop.eup %1667 }
 0x2af   :  { %v304_v63 = vsel %vm137_vm2, %v1668_v62, 0.0  ;;  %v1670_v2 = vpop.eup %1669 }
 0x2b0   :  { %305 = vadd.xlane.f32.xlu0 %v304_v63  ;;  %v481_v3 = vsel %vm137_vm2, %v1670_v2, 0.0 }
 0x2b5   :  { %877 = vrot.lane.b32.xlu1 %v1840_v20, %s1746_s17 }
 0x2c6   :  { %799 = vrot.lane.b32.xlu0 %v1833_v17, %s1746_s17 }
 0x2ca   :  { %797 = vrot.lane.b32.xlu0 %v1833_v17, %s1747_s18 }
 0x2d9   :  { %482 = vadd.xlane.f32.xlu1 %v481_v3 }
 0x2ea   :  { %875 = vrot.lane.b32.xlu1 %v1840_v20, %s1747_s18 }
 0x32d   :  { %v303_v11 = vpop.xlane.xlu1 %302 }
 0x331   :  { %v878_v16 = vpop.permute.xlu1 %877 }
 0x332   :  { %v486_v5 = vpop.xlane.xlu0 %485 }
 0x333   :  { %1671 = vrcp.f32 %v486_v5 }
 0x339   :  { %v306_v6 = vpop.xlane.xlu0 %305 }
 0x33a   :  { %1673 = vrcp.f32 %v306_v6 }
 0x33b   :  { %1675 = vrcp.f32 %v303_v11 }
 0x33d   :  { %v800_v30 = vpop.permute.xlu0 %799 }
 0x340   :  { %v1672_v8 = vpop.eup %1671 }
 0x341   :  { %v490_v10 = vmul.f32 %v1672_v8, %v1666_v60  ;;  %v798_v32 = vpop.permute.xlu0 %797 }
 0x343   :  { %1596 = vmatmul.mubr.msk.f32.vlgmr.msra.gmra.mxu0 %vm137_vm2, %v490_v10 }
 0x344   :  { %1604 = vmatpush3.msra.mxu0 %v722_v9  ;;  %1605 = vmatprep.mubr.msk.f32.mxu0 %vm1740_vm1, %v1739_v4 }
 0x345   :  { %1613 = vmatprep.subr.mxu0 %v1739_v4 }
 0x347   :  { %v1674_v13 = vpop.eup %1673 }
 0x348   :  { %v310_v15 = vmul.f32 %v1674_v13, %v1668_v62  ;;  %v1676_v26 = vpop.eup %1675 }
 0x349   :  { %v309_v29 = vmul.f32 %v1676_v26, %v1664_v58 }
 0x34a   :  { %v1901_v19 = vadd.f32 %v490_v10, %v310_v15  ;;  %1606 = vmatmul.mubr.msk.f32.vlgmr.msra.gmra.mxu0 %vm137_vm2, %v310_v15 }
 0x34b   :  { %1614 = vmatpush3.xpose.msk.msra.mxu0 %vm137_vm2, %v878_v16  ;;  %1615 = vmatprep.mubr.msk.f32.mxu0 %vm1740_vm1, %v1739_v4 }
 0x34c   :  { %1623 = vmatprep.subr.mxu0 %v1739_v4 }
 0x362   :  { %v483_v22 = vpop.xlane.xlu1 %482 }
 0x363   :  { %1677 = vrcp.f32 %v483_v22 }
 0x366   :  { %v876_v25 = vpop.permute.xlu1 %875 }
 0x367   :  { %1616 = vmatmul.mubr.msk.f32.vlgmr.msra.gmra.mxu0 %vm137_vm2, %v876_v25 }
 0x368   :  { %1624 = vmatpush3.msra.mxu0 %v1911_v24  ;;  %1625 = vmatprep.mubr.msk.f32.mxu0 %vm1740_vm1, %v1739_v4 }
 0x369   :  { %1633 = vmatprep.subr.mxu0 %v1739_v4 }
 0x370   :  { %v1678_v12 = vpop.eup %1677 }
 0x371   :  { %v489_v27 = vmul.f32 %v1678_v12, %v1670_v2 }
 0x373   :  { %1591 = vmatmul.mubr.msk.f32.vlgmr.msra.gmra.mxu1 %vm137_vm2, %v489_v27  ;;  %v1919_v14 = vadd.f32 %v489_v27, %v309_v29 }
 0x374   :  { %1599 = vmatpush3.msra.mxu1 %v646_v7  ;;  %1600 = vmatprep.mubr.msk.f32.mxu1 %vm1740_vm1, %v1739_v4 }
 0x375   :  { %1608 = vmatprep.subr.mxu1 %v1739_v4 }
 0x377   :  { %1601 = vmatmul.mubr.msk.f32.vlgmr.msra.gmra.mxu1 %vm137_vm2, %v309_v29 }
 0x378   :  { %1609 = vmatpush3.xpose.msk.msra.mxu1 %vm137_vm2, %v800_v30  ;;  %1610 = vmatprep.mubr.msk.f32.mxu1 %vm1740_vm1, %v1739_v4 }
 0x379   :  { %1618 = vmatprep.subr.mxu1 %v1739_v4 }
 0x37b   :  { %1611 = vmatmul.mubr.msk.f32.vlgmr.msra.gmra.mxu1 %vm137_vm2, %v798_v32 }
 0x37c   :  { %1619 = vmatpush3.msra.mxu1 %v1930_v31  ;;  %1620 = vmatprep.mubr.msk.f32.mxu1 %vm1740_vm1, %v1739_v4 }
 0x37d   :  { %1628 = vmatprep.subr.mxu1 %v1739_v4 }
 0x403   :  { %v641_v33 = vpop.f32.mrf.mxu0 }
 0x405   :  { %v1597_v34 = vpop.f32.mrf.mxu0 }
 0x40a   :  { %v793_v35 = vpop.f32.mrf.mxu0 }
 0x40b   :  { %v1937_v36 = vadd.f32 %v793_v35, %v641_v33 }
 0x40c   :  { %v1607_v37 = vpop.f32.mrf.mxu0 }
 0x427   :  { %v949_v38 = vpop.f32.mrf.mxu0 }
 0x428   :  { %v950_v18 = vadd.f32 %v1871_v28, %v949_v38 }
 0x429   :  { %v1617_v39 = vpop.f32.mrf.mxu0 }
 0x42a   :  { %v956_v40 = vsel %vm137_vm2, %v950_v18, -inf }
 0x42b   :  { %957 = vmax.xlane.f32.xlu1 %v956_v40 }
 0x433   :  { %v565_v41 = vpop.f32.mrf.mxu1 }
 0x435   :  { %v1592_v42 = vpop.f32.mrf.mxu1 }
 0x437   :  { %v717_v43 = vpop.f32.mrf.mxu1 }
 0x438   :  { %v718_v44 = vadd.f32 %v717_v43, %v565_v41 }
 0x439   :  { %v1602_v45 = vpop.f32.mrf.mxu1 }
 0x43b   :  { %v871_v46 = vpop.f32.mrf.mxu1 }
 0x43c   :  { %v872_v47 = vadd.f32 %v1871_v28, %v871_v46  ;;  %1127 = vrot.lane.b32.xlu1 %v1833_v17, %s1748_s19 }
 0x43d   :  { %v1612_v48 = vpop.f32.mrf.mxu1 }
 0x43e   :  { %v953_v49 = vsel %vm137_vm2, %v872_v47, -inf }
 0x43f   :  { %954 = vmax.xlane.f32.xlu0 %v953_v49 }
 0x440   :  { %1125 = vrot.lane.b32.xlu1 %v1833_v17, %s1749_s20 }
 0x444   :  { %1203 = vrot.lane.b32.xlu1 %v1840_v20, %s1749_s20 }
 0x4b4   :  { %v958_v50 = vpop.xlane.xlu1 %957 }
 0x4b5   :  { %v960_v51 = vsub.f32 %v950_v18, %v958_v50 }
 0x4b7   :  { %v963_v52 = vmul.f32 1.442695, %v960_v51 }
 0x4b8   :  { %v1128_v61 = vpop.permute.xlu1 %1127 }
 0x4b9   :  { %1679 = vpow2.f32 %v963_v52 }
 0x4bc   :  { %v1126_v1 = vpop.permute.xlu1 %1125 }
 0x4c6   :  { %v1680_v53 = vpop.eup %1679 }
 0x4c7   :  { %v968_v54 = vsel %vm137_vm2, %v1680_v53, 0.0 }
 0x4c8   :  { %969 = vadd.xlane.f32.xlu0 %v968_v54  ;;  %v955_v55 = vpop.xlane.xlu0 %954 }
 0x4c9   :  { %v959_v56 = vsub.f32 %v872_v47, %v955_v55 }
 0x4cb   :  { %v961_v57 = vmul.f32 1.442695, %v959_v56 }
 0x4cd   :  { %1681 = vpow2.f32 %v961_v57 }
 0x4da   :  { %v1682_v58 = vpop.eup %1681 }
 0x4db   :  { %v965_v59 = vsel %vm137_vm2, %v1682_v58, 0.0 }
 0x4dc   :  { %966 = vadd.xlane.f32.xlu0 %v965_v59 }
 0x4f2   :  { %1205 = vrot.lane.b32.xlu0 %v1840_v20, %s1748_s19  ;;  %v1204_v20 = vpop.permute.xlu1 %1203 }
 0x551   :  { %v970_v17 = vpop.xlane.xlu0 %969 }
 0x552   :  { %1683 = vrcp.f32 %v970_v17 }
 0x55f   :  { %v1684_v60 = vpop.eup %1683 }
 0x560   :  { %v974_v62 = vmul.f32 %v1684_v60, %v1680_v53 }
 0x562   :  { %1626 = vmatmul.mubr.msk.f32.vlgmr.msra.gmra.mxu0 %vm137_vm2, %v974_v62  ;;  %v976_v63 = vadd.f32 %v974_v62, %v1901_v19 }
 0x563   :  { %1635 = vmatprep.mubr.msk.f32.mxu0 %vm1740_vm1, %v1739_v4 }
 0x565   :  { %v967_v0 = vpop.xlane.xlu0 %966 }
 0x566   :  { %1685 = vrcp.f32 %v967_v0 }
 0x569   :  { %v1206_v2 = vpop.permute.xlu0 %1205 }
 0x56a   :  { %1634 = vmatpush3.xpose.msk.msra.mxu0 %vm137_vm2, %v1206_v2 }
 0x56b   :  { %1643 = vmatprep.subr.mxu0 %v1739_v4 }
 0x56d   :  { %1636 = vmatmul.mubr.msk.f32.vlgmr.msra.gmra.mxu0 %vm137_vm2, %v1204_v20 }
 0x56e   :  { %1645 = vmatprep.mubr.msk.f32.mxu0 %vm1740_vm1, %v1739_v4 }
 0x573   :  { %v1686_v3 = vpop.eup %1685 }
 0x574   :  { %v973_v5 = vmul.f32 %v1686_v3, %v1682_v58 }
 0x576   :  { %1621 = vmatmul.mubr.msk.f32.vlgmr.msra.gmra.mxu1 %vm137_vm2, %v973_v5  ;;  %v975_v6 = vadd.f32 %v973_v5, %v1919_v14 }
 0x577   :  { %1629 = vmatpush3.xpose.msk.msra.mxu1 %vm137_vm2, %v1128_v61  ;;  %1630 = vmatprep.mubr.msk.f32.mxu1 %vm1740_vm1, %v1739_v4 }
 0x578   :  { %1638 = vmatprep.subr.mxu1 %v1739_v4 }
 0x57a   :  { %1631 = vmatmul.mubr.msk.f32.vlgmr.msra.gmra.mxu1 %vm137_vm2, %v1126_v1 }
 0x57b   :  { %1640 = vmatprep.mubr.msk.f32.mxu1 %vm1740_vm1, %v1739_v4 }
 0x622   :  { %v1119_v7 = vpop.f32.mrf.mxu0 }
 0x623   :  { %v1968_v8 = vadd.f32 %v1119_v7, %v1937_v36 }
 0x624   :  { %v1627_v9 = vpop.f32.mrf.mxu0 }
 0x62d   :  { %v1277_v10 = vpop.f32.mrf.mxu0 }
 0x62e   :  { %v1278_v11 = vadd.f32 %v1871_v28, %v1277_v10 }
 0x62f   :  { %v1637_v13 = vpop.f32.mrf.mxu0 }
 0x630   :  { %v1284_v15 = vsel %vm137_vm2, %v1278_v11, -inf }
 0x631   :  { %1285 = vmax.xlane.f32.xlu1 %v1284_v15 }
 0x636   :  { %v1046_v16 = vpop.f32.mrf.mxu1 }
 0x637   :  { %v1972_v19 = vadd.f32 %v1046_v16, %v718_v44 }
 0x638   :  { %v1622_v21 = vpop.f32.mrf.mxu1 }
 0x63a   :  { %v1199_v22 = vpop.f32.mrf.mxu1 }
 0x63b   :  { %v1200_v23 = vadd.f32 %v1871_v28, %v1199_v22 }
 0x63c   :  { %v1632_v4 = vpop.f32.mrf.mxu1 }
 0x63d   :  { %v1281_v25 = vsel %vm137_vm2, %v1200_v23, -inf }
 0x63e   :  { %1282 = vmax.xlane.f32.xlu0 %v1281_v25 }
 0x642   :  { %1306 = vrot.lane.b32.xlu1 %v1930_v31, %s1742_s14 }
 0x6ba   :  { %v1286_v26 = vpop.xlane.xlu1 %1285 }
 0x6bb   :  { %v1288_v12 = vsub.f32 %v1278_v11, %v1286_v26 }
 0x6bd   :  { %v1291_v27 = vmul.f32 1.442695, %v1288_v12 }
 0x6be   :  { %v1307_v29 = vpop.permute.xlu1 %1306 }
 0x6bf   :  { %1687 = vpow2.f32 %v1291_v27  ;;  %1639 = vmatpush3.msra.mxu1 %v1307_v29 }
 0x6c7   :  { %v1283_v14 = vpop.xlane.xlu0 %1282 }
 0x6c8   :  { %v1287_v30 = vsub.f32 %v1200_v23, %v1283_v14 }
 0x6ca   :  { %v1289_v32 = vmul.f32 1.442695, %v1287_v30 }
 0x6cc   :  { %v1688_v33 = vpop.eup %1687  ;;  %1689 = vpow2.f32 %v1289_v32 }
 0x6cd   :  { %v1296_v28 = vsel %vm137_vm2, %v1688_v33, 0.0 }
 0x6ce   :  { %1297 = vadd.xlane.f32.xlu0 %v1296_v28 }
 0x6d9   :  { %v1690_v34 = vpop.eup %1689 }
 0x6da   :  { %v1293_v35 = vsel %vm137_vm2, %v1690_v34, 0.0 }
 0x6db   :  { %1294 = vadd.xlane.f32.xlu0 %v1293_v35 }
 0x6f1   :  { %1383 = vrot.lane.b32.xlu0 %v1911_v24, %s1742_s14 }
 0x757   :  { %v1298_v31 = vpop.xlane.xlu0 %1297 }
 0x758   :  { %1691 = vrcp.f32 %v1298_v31 }
 0x764   :  { %v1295_v36 = vpop.xlane.xlu0 %1294 }
 0x765   :  { %v1692_v37 = vpop.eup %1691  ;;  %1693 = vrcp.f32 %v1295_v36 }
 0x766   :  { %v1302_v38 = vmul.f32 %v1692_v37, %v1688_v33 }
 0x768   :  { %v1384_v18 = vpop.permute.xlu0 %1383  ;;  %v1304_v39 = vadd.f32 %v1302_v38, %v976_v63 }
 0x769   :  { %1644 = vmatpush3.msra.mxu0 %v1384_v18 }
 0x76a   :  { %1646 = vmatmul.mubr.msk.f32.vlgmr.msra.gmra.mxu0 %vm137_vm2, %v1302_v38  ;;  %v1473_v40 = vmul.f32 0.25, %v1304_v39 }
 0x76c   :  { %1475 = vst.msk [vmem:[#allocation4 + $0x8] sm:$0xff] %vm137_vm2, %v1473_v40 }
 0x772   :  { %v1694_v41 = vpop.eup %1693 }
 0x773   :  { %v1301_v42 = vmul.f32 %v1694_v41, %v1690_v34 }
 0x775   :  { %1641 = vmatmul.mubr.msk.f32.vlgmr.msra.gmra.mxu1 %vm137_vm2, %v1301_v42  ;;  %v1303_v43 = vadd.f32 %v1301_v42, %v975_v6 }
 0x777   :  { %v1472_v24 = vmul.f32 0.25, %v1303_v43 }
 0x779   :  { %1474 = vst.msk [vmem:[#allocation4] sm:$0xff] %vm137_vm2, %v1472_v24 }
 0x77a   :  { %1706 = shalt.err (!%p1703_p4)
}
 0x77b   :  { %s1751_s24 = smov 128   ;;  %s1752_s25 = smov 8   ;;  %v1535_v45 = vld [vmem:[%s2002_s3] ss:$0 sm:$0xff] }
 0x77c   :  { %1499 = dma.vmem_to_hbm [thread:$0]  %s1494_s22, 256, %s2004_s5, [#allocation5], %s1751_s24, %s1751_s24, %s1752_s25  }
 0x77d   :  { %s1753_s30 = smov [#allocation2]  }
 0x77e   :  { %s1481_s6 = sshll.u32 %s1753_s30, 4  ;;  %s1482_s6 = int_to_ptr.vmem [resolvable:$true] %s1481_s6 }
 0x77f   :  { %s1715_s5 = scalar_lea.vmem %s1482_s6, 256  ;;  %p1720_p6 = scmp.lt.s32.totalorder %s1482_s6, %s1482_s6 }
 0x780   :  { %p1716_p5 = scmp.ne.s32.totalorder %s1482_s6, %s1715_s5  ;;  %p1721_p7 = scmp.lt.s32.totalorder %s1715_s5, %s1715_s5 }
 0x782   :  { %p1722_p8 = por %p1721_p7, %p1720_p6 }
 0x784   :  { %p1723_p9 = pnand %p1722_p8, %p1716_p5 }
 0x82a   :  { %v1455_v44 = vpop.f32.mrf.mxu0 }
 0x82b   :  { %v1460_v46 = vadd.f32 %v1455_v44, %v1968_v8 }
 0x82c   :  { %v1647_v47 = vpop.f32.mrf.mxu0 }
 0x82d   :  { %v1469_v48 = vadd.f32 %v1535_v45, %v1460_v46 }
 0x82f   :  { %1471 = vst.msk [vmem:[#allocation2 + $0x8] sm:$0xff] %vm43_vm0, %v1469_v48 }
 0x835   :  { %v1378_v49 = vpop.f32.mrf.mxu1 }
 0x836   :  { %v1459_v50 = vadd.f32 %v1378_v49, %v1972_v19 }
 0x837   :  { %v1642_v51 = vpop.f32.mrf.mxu1 }
 0x838   :  { %v1468_v52 = vadd.f32 %v1535_v45, %v1459_v50 }
 0x83a   :  { %1470 = vst.msk [vmem:[#allocation2] sm:$0xff] %vm43_vm0, %v1468_v52 }
 0x83b   :  { %1726 = shalt.err (!%p1723_p9)
}
 0x83c   :  { %1487 = dma.vmem_to_hbm [thread:$0]  %s1482_s6, 256, %s2003_s4, [#allocation3], %s1751_s24, %s1751_s24, %s1752_s25  }
 0x83d   :  { %1735 = dma.done.wait [#allocation3], 256  }
 0x83e   :  { %1736 = vsyncadd [#allocation3], 4294967040 }
 0x83f   :  { %1737 = dma.done.wait [#allocation5], 256  }
 0x840   :  { %1738 = vsyncadd [#allocation5], 4294967040 }
 0x841   :  { %1506 = vsyncpa [#allocation3], 1 }
 0x842   :  { %1507 = vsyncpa [#allocation5], 1 }

</bundles_post_ra>
